<compile_context>
chip_gen: v7x
topology: tpu7x:2x2x1
jax: 0.10.0
libtpu: 0.0.40
codegen_flags: <defaults>
</compile_context>

<pallas_src>
import functools
import math

import jax
import jax.numpy as jnp
from jax.experimental import pallas as pl
from jax.experimental.pallas import tpu as pltpu


# ----------------------------------------------------------------------------
# Polynomial activation with coefficients baked in as constants
# ----------------------------------------------------------------------------
def _poly_eval(h, coefs):
    """Horner evaluation: r = c[d]; for i in d-1..0: r = c[i] + h * r.
    `coefs` is a Python tuple -> constants folded at trace time."""
    degree = len(coefs) - 1
    if degree == 0:
        return jnp.full_like(h, float(coefs[0]))
    # Fuse the first two Horner steps: r = c[d-1] + h * c[d]
    c_top = float(coefs[degree])
    r = h if c_top == 1.0 else h * c_top
    c = float(coefs[degree - 1])
    if c != 0.0:
        r = r + c
    for i in range(degree - 2, -1, -1):
        r = h * r
        c = float(coefs[i])
        if c != 0.0:
            r = r + c
    return r


def _poly_coefficients(degree):
    if degree == 1:
        return (0.0, 1.0)
    elif degree == 2:
        return (0.0, 1.0, 0.01)
    elif degree == 3:
        return (0.0, 1.0, 0.01, 0.001)
    else:
        return (0.0, 1.0, 0.01)


# ----------------------------------------------------------------------------
# Fused MLP kernel: all layers in one body, activations stay on-chip
# ----------------------------------------------------------------------------
def _fused_mlp_kernel(*refs, coeffs, n_layers):
    # refs = (x_ref, wt_0, b_0, wt_1, b_1, ..., wt_{L-1}, b_{L-1}, o_ref)
    x_ref, o_ref = refs[0], refs[-1]
    h = x_ref[...]
    for li in range(n_layers):
        wt = refs[1 + 2 * li][...]          # (in, out)  pre-transposed
        b = refs[2 + 2 * li][...]           # (1, out)
        h = jnp.dot(h, wt, preferred_element_type=jnp.float32) + b
        if li < n_layers - 1:               # hidden layers get the poly act
            h = _poly_eval(h, coeffs)
    # TODO(synk): out_dim==1 means a masked (vst.msk) store; if batch grows to
    # many thousands, emit (1, batch) lane-major output and transpose outside.
    o_ref[...] = h.astype(o_ref.dtype)


def fhe_nn_forward(x, weights_t, biases, *, coeffs, degree, tile_b=512):
    """x: (batch, in_dim) f32. weights_t[i]: (in_i, out_i). biases[i]: (1, out_i)."""
    del degree  # implied by len(coeffs); kept for API parity with the module
    batch, in_dim = x.shape
    out_dim = weights_t[-1].shape[1]
    n_layers = len(weights_t)

    # Batch tiling: single full block for small batches, 512-row tiles otherwise.
    tb = batch if batch <= tile_b else tile_b
    grid = (pl.cdiv(batch, tb),)

    in_specs = [pl.BlockSpec((tb, in_dim), lambda i: (i, 0))]
    for wt, b in zip(weights_t, biases):
        in_specs.append(pl.BlockSpec(wt.shape, lambda i: (0, 0)))  # resident
        in_specs.append(pl.BlockSpec(b.shape, lambda i: (0, 0)))   # resident
    out_specs = pl.BlockSpec((tb, out_dim), lambda i: (i, 0))

    kernel = functools.partial(_fused_mlp_kernel, coeffs=coeffs,
                               n_layers=n_layers)

    args = [x]
    for wt, b in zip(weights_t, biases):
        args.append(wt)
        args.append(b)

    return pl.pallas_call(
        kernel,
        out_shape=jax.ShapeDtypeStruct((batch, out_dim), jnp.float32),
        grid=grid,
        in_specs=in_specs,
        out_specs=out_specs,
        compiler_params=pltpu.CompilerParams(
            dimension_semantics=("parallel",)),   # batch rows independent
    )(*args)


# ----------------------------------------------------------------------------
# Parameter construction (mirrors FHECompatibleNN.__init__, deterministic)
# Weights are stored PRE-TRANSPOSED as (in, out); biases as (1, out).
# ----------------------------------------------------------------------------
def init_fhe_nn_params(key, input_dim=13, hidden_dims=(), poly_degree=1):
    hidden_dims = list(hidden_dims)
    degree = poly_degree if poly_degree in (1, 2, 3) else 2
    coeffs = _poly_coefficients(degree)       # Python tuple, baked into kernel
    dims = [input_dim] + hidden_dims + [1]
    n_layers = len(dims) - 1
    keys = jax.random.split(key, n_layers)
    weights_t, biases = [], []
    for li in range(n_layers):
        fan_in, fan_out = dims[li], dims[li + 1]
        is_last = (li == n_layers - 1)
        scale = 1000.0 if is_last else 1.0
        bound = math.sqrt(6.0 / (fan_in + fan_out))   # xavier_uniform_
        w = jax.random.uniform(keys[li], (fan_out, fan_in), jnp.float32,
                               -bound, bound) * scale
        weights_t.append(jnp.asarray(w.T))            # (in, out), transposed ONCE
        biases.append(jnp.full((1, fan_out),
                               91000.0 if is_last else 0.0, jnp.float32))
    return tuple(weights_t), tuple(biases), coeffs, degree


# ----------------------------------------------------------------------------
# Pure-JAX reference (for correctness check)
# ----------------------------------------------------------------------------
def _ref_forward(x, weights_t, biases, coeffs, degree):
    def poly(v):
        r = jnp.full_like(v, coeffs[degree])
        for i in range(degree - 1, -1, -1):
            r = coeffs[i] + v * r
        return r

    n_layers = len(weights_t)
    for i in range(n_layers - 1):
        x = poly(x @ weights_t[i] + biases[i])
    return x @ weights_t[-1] + biases[-1]


# ----------------------------------------------------------------------------
if __name__ == "__main__":
    key = jax.random.PRNGKey(0)
    k_x, k_p = jax.random.split(key)

    input_dim = 13
    hidden_dims = [32, 16]
    poly_degree = 2
    batch = 8

    x = jax.random.normal(k_x, (batch, input_dim), jnp.float32)
    weights_t, biases, coeffs, degree = init_fhe_nn_params(
        k_p, input_dim=input_dim, hidden_dims=hidden_dims,
        poly_degree=poly_degree)

    forward = jax.jit(functools.partial(fhe_nn_forward, coeffs=coeffs,
                                        degree=degree))
    out = forward(x, weights_t, biases)
    out = jax.block_until_ready(out)

    ref = _ref_forward(x, weights_t, biases, coeffs, degree)
    assert out.shape == (batch, 1), out.shape
    assert jnp.allclose(out, ref, rtol=1e-5, atol=1e-2), (out, ref)

    print("KERNEL_OK")
</pallas_src>

<mosaic_0001>
module attributes {stable_mosaic.version = 11 : i64} {
  func.func @_fused_mlp_kernel(%arg0: i32, %arg1: memref<8x13xf32, #tpu.memory_space<vmem>>, %arg2: memref<13x32xf32, #tpu.memory_space<vmem>>, %arg3: memref<1x32xf32, #tpu.memory_space<vmem>>, %arg4: memref<32x16xf32, #tpu.memory_space<vmem>>, %arg5: memref<1x16xf32, #tpu.memory_space<vmem>>, %arg6: memref<16x1xf32, #tpu.memory_space<vmem>>, %arg7: memref<1x1xf32, #tpu.memory_space<vmem>>, %arg8: memref<8x1xf32, #tpu.memory_space<vmem>>) attributes {dimension_semantics = [#tpu.dimension_semantics<parallel>], iteration_bounds = array<i64: 1>, scalar_prefetch = 0 : i64, scratch_operands = 0 : i64, tpu.core_type = #tpu.core_type<tc>, window_params = [{transform_indices = @transform_0, window_bounds = array<i64: 8, 13>}, {pipeline_mode = #tpu.pipeline_mode<synchronous>, transform_indices = @transform_1, window_bounds = array<i64: 13, 32>}, {pipeline_mode = #tpu.pipeline_mode<synchronous>, transform_indices = @transform_2, window_bounds = array<i64: 1, 32>}, {pipeline_mode = #tpu.pipeline_mode<synchronous>, transform_indices = @transform_3, window_bounds = array<i64: 32, 16>}, {pipeline_mode = #tpu.pipeline_mode<synchronous>, transform_indices = @transform_4, window_bounds = array<i64: 1, 16>}, {pipeline_mode = #tpu.pipeline_mode<synchronous>, transform_indices = @transform_5, window_bounds = array<i64: 16, 1>}, {pipeline_mode = #tpu.pipeline_mode<synchronous>, transform_indices = @transform_6, window_bounds = array<i64: 1, 1>}, {transform_indices = @transform_7, window_bounds = array<i64: 8, 1>}]} {
    %c0 = arith.constant 0 : index
    %c0_0 = arith.constant 0 : index
    %0 = vector.load %arg1[%c0, %c0_0] : memref<8x13xf32, #tpu.memory_space<vmem>>, vector<8x13xf32>
    %c0_1 = arith.constant 0 : index
    %c0_2 = arith.constant 0 : index
    %1 = vector.load %arg2[%c0_1, %c0_2] : memref<13x32xf32, #tpu.memory_space<vmem>>, vector<13x32xf32>
    %c0_3 = arith.constant 0 : index
    %c0_4 = arith.constant 0 : index
    %2 = vector.load %arg3[%c0_3, %c0_4] : memref<1x32xf32, #tpu.memory_space<vmem>>, vector<1x32xf32>
    %cst = arith.constant dense<0.000000e+00> : vector<8x32xf32>
    %3 = tpu.matmul %0, %1, %cst {dimension_numbers = #tpu.dot_dimension_numbers<[1], [0], [0], [1], [0, 0, 1, 1], [], []>} : vector<8x13xf32>, vector<13x32xf32>, vector<8x32xf32> -> vector<8x32xf32>
    %4 = vector.broadcast %2 : vector<1x32xf32> to vector<8x32xf32>
    %5 = arith.addf %3, %4 : vector<8x32xf32>
    %cst_5 = arith.constant 0.00999999977 : f32
    %6 = vector.broadcast %cst_5 : f32 to vector<8x32xf32>
    %7 = arith.mulf %5, %6 : vector<8x32xf32>
    %cst_6 = arith.constant 1.000000e+00 : f32
    %8 = vector.broadcast %cst_6 : f32 to vector<8x32xf32>
    %9 = arith.addf %7, %8 : vector<8x32xf32>
    %10 = arith.mulf %5, %9 : vector<8x32xf32>
    %c0_7 = arith.constant 0 : index
    %c0_8 = arith.constant 0 : index
    %11 = vector.load %arg4[%c0_7, %c0_8] : memref<32x16xf32, #tpu.memory_space<vmem>>, vector<32x16xf32>
    %c0_9 = arith.constant 0 : index
    %c0_10 = arith.constant 0 : index
    %12 = vector.load %arg5[%c0_9, %c0_10] : memref<1x16xf32, #tpu.memory_space<vmem>>, vector<1x16xf32>
    %cst_11 = arith.constant dense<0.000000e+00> : vector<8x16xf32>
    %13 = tpu.matmul %10, %11, %cst_11 {dimension_numbers = #tpu.dot_dimension_numbers<[1], [0], [0], [1], [0, 0, 1, 1], [], []>} : vector<8x32xf32>, vector<32x16xf32>, vector<8x16xf32> -> vector<8x16xf32>
    %14 = vector.broadcast %12 : vector<1x16xf32> to vector<8x16xf32>
    %15 = arith.addf %13, %14 : vector<8x16xf32>
    %cst_12 = arith.constant 0.00999999977 : f32
    %16 = vector.broadcast %cst_12 : f32 to vector<8x16xf32>
    %17 = arith.mulf %15, %16 : vector<8x16xf32>
    %cst_13 = arith.constant 1.000000e+00 : f32
    %18 = vector.broadcast %cst_13 : f32 to vector<8x16xf32>
    %19 = arith.addf %17, %18 : vector<8x16xf32>
    %20 = arith.mulf %15, %19 : vector<8x16xf32>
    %c0_14 = arith.constant 0 : index
    %c0_15 = arith.constant 0 : index
    %21 = vector.load %arg6[%c0_14, %c0_15] : memref<16x1xf32, #tpu.memory_space<vmem>>, vector<16x1xf32>
    %c0_16 = arith.constant 0 : index
    %c0_17 = arith.constant 0 : index
    %22 = vector.load %arg7[%c0_16, %c0_17] : memref<1x1xf32, #tpu.memory_space<vmem>>, vector<1x1xf32>
    %cst_18 = arith.constant dense<0.000000e+00> : vector<8x1xf32>
    %23 = tpu.matmul %20, %21, %cst_18 {dimension_numbers = #tpu.dot_dimension_numbers<[1], [0], [0], [1], [0, 0, 1, 1], [], []>} : vector<8x16xf32>, vector<16x1xf32>, vector<8x1xf32> -> vector<8x1xf32>
    %24 = vector.broadcast %22 : vector<1x1xf32> to vector<8x1xf32>
    %25 = arith.addf %23, %24 : vector<8x1xf32>
    %c0_19 = arith.constant 0 : index
    %c0_20 = arith.constant 0 : index
    %26 = vector.load %arg8[%c0_19, %c0_20] : memref<8x1xf32, #tpu.memory_space<vmem>>, vector<8x1xf32>
    tpu.vector_store %arg8[%c0_19, %c0_20], %25 {strides = array<i32>} : memref<8x1xf32, #tpu.memory_space<vmem>>, vector<8x1xf32>,
    return
  }
  func.func @transform_0(%arg0: i32) -> (i32, i32) {
    %c0_i32 = arith.constant 0 : i32
    %c0_i32_0 = arith.constant 0 : i32
    return %arg0, %c0_i32 : i32, i32
  }
  func.func @transform_1(%arg0: i32) -> (i32, i32) {
    %c0_i32 = arith.constant 0 : i32
    %c0_i32_0 = arith.constant 0 : i32
    %c0_i32_1 = arith.constant 0 : i32
    return %c0_i32, %c0_i32_0 : i32, i32
  }
  func.func @transform_2(%arg0: i32) -> (i32, i32) {
    %c0_i32 = arith.constant 0 : i32
    %c0_i32_0 = arith.constant 0 : i32
    %c0_i32_1 = arith.constant 0 : i32
    return %c0_i32, %c0_i32_0 : i32, i32
  }
  func.func @transform_3(%arg0: i32) -> (i32, i32) {
    %c0_i32 = arith.constant 0 : i32
    %c0_i32_0 = arith.constant 0 : i32
    %c0_i32_1 = arith.constant 0 : i32
    return %c0_i32, %c0_i32_0 : i32, i32
  }
  func.func @transform_4(%arg0: i32) -> (i32, i32) {
    %c0_i32 = arith.constant 0 : i32
    %c0_i32_0 = arith.constant 0 : i32
    %c0_i32_1 = arith.constant 0 : i32
    return %c0_i32, %c0_i32_0 : i32, i32
  }
  func.func @transform_5(%arg0: i32) -> (i32, i32) {
    %c0_i32 = arith.constant 0 : i32
    %c0_i32_0 = arith.constant 0 : i32
    %c0_i32_1 = arith.constant 0 : i32
    return %c0_i32, %c0_i32_0 : i32, i32
  }
  func.func @transform_6(%arg0: i32) -> (i32, i32) {
    %c0_i32 = arith.constant 0 : i32
    %c0_i32_0 = arith.constant 0 : i32
    %c0_i32_1 = arith.constant 0 : i32
    return %c0_i32, %c0_i32_0 : i32, i32
  }
  func.func @transform_7(%arg0: i32) -> (i32, i32) {
    %c0_i32 = arith.constant 0 : i32
    %c0_i32_0 = arith.constant 0 : i32
    return %arg0, %c0_i32 : i32, i32
  }
}

</mosaic_0001>

<bundles_post_ra>
// kernel: fhe_nn_forward.1
= control target key start
LH: loop header
LB: loop body
LE: loop exit
PB: predicated region body
PF: predicated region fallthrough
CT: control target
= control target key end

     0   :  { %vm42_vm0 = vcmask 1044480   ;;  %v356_v0 = vmov 0.0|0.0   ;;  %vm357_vm1 = vmmov 1   ;;  %vm358_vm3 = vmmov 0   ;;  %s439_s1 = inlined_call_operand.vmem [shape: f32[13,32], index: 1, kind: input, shape index: {}]   ;;  %s440_s0 = inlined_call_operand.vmem [shape: f32[8,13], index: 0, kind: input, shape index: {}]   ;;  %s441_s3 = inlined_call_operand.vmem [shape: f32[32,16], index: 3, kind: input, shape index: {}]   ;;  %s442_s2 = inlined_call_operand.vmem [shape: f32[1,32], index: 2, kind: input, shape index: {}]   ;;  %s443_s5 = inlined_call_operand.vmem [shape: f32[16,1], index: 5, kind: input, shape index: {}]   ;;  %s444_s6 = inlined_call_operand.<no memory space> [shape: f32[1,1], index: 6, kind: input, shape index: {}]   ;;  %s445_s4 = inlined_call_operand.vmem [shape: f32[1,16], index: 4, kind: input, shape index: {}]   ;;  %s446_s7 = inlined_call_operand.vmem [shape: f32[8,1], index: 7, kind: output, shape index: {}]  }
   0x1   :  { %339 = vmatprep.subr.bf16.mxu0 %v356_v0  ;;  %v29_v1 = vld [vmem:[%s439_s1] sm:$0xff]  ;;  %v30_v2 = vld [vmem:[%s439_s1 + $0x8] sm:$0x1f]  ;;  %vm341_vm2 = vmpackc.low %vm42_vm0, %vm357_vm1  ;;  %343 = vmatprep.subr.bf16.mxu1 %v356_v0  ;;  %v359_v4 = vmov 0.0   ;;  %vm38_vm4 = vcmask 105472   ;;  %vm130_vm5 = vcmask 261120   ;;  %v12_v22 = vstv %s444_s6 }
   0x2   :  { %v340_v3 = vpack.c.bf16 %v30_v2, %v29_v1  ;;  %318 = vmatprep.mubr.msk.f32.mxu0 %vm358_vm3, %v359_v4  ;;  %329 = vmatprep.mubr.msk.f32.mxu1 %vm358_vm3, %v359_v4  ;;  %v28_v5 = vld [vmem:[%s440_s0] sm:$0xff]  ;;  %v120_v7 = vld [vmem:[%s441_s3 + $0x8] sm:$0xff]  ;;  %v121_v9 = vld [vmem:[%s441_s3 + $0x10] sm:$0xff]  ;;  %13 = vst [vmem:[#allocation2] sm:$0x1] %v12_v22  ;;  %vm216_vm6 = vcmask 130048  }
   0x3   :  { %v119_v6 = vld [vmem:[%s441_s3] sm:$0xff]  ;;  %v122_v10 = vld [vmem:[%s441_s3 + $0x18] sm:$0xff]  ;;  %v208_v20 = vld [vmem:[%s443_s5 + $0x8] sm:$0xff]  ;;  %vm290_vm7 = vcmask 7168  }
   0x4   :  { %342 = vmatpush3.bf16.msk.msra.mxu0 %vm341_vm2, %v340_v3  ;;  %v344_v8 = vpack.c.bf16 %v120_v7, %v119_v6  ;;  %v347_v11 = vpack.c.bf16 %v122_v10, %v121_v9  ;;  %v296_v12 = vld [vmem:[%s442_s2] ss:$0 sm:$0xff] }
   0x5   :  { %349 = vmatprep.subr.bf16.mxu0 %v356_v0  ;;  %v207_v19 = vld [vmem:[%s443_s5] sm:$0xff] }
   0x6   :  { %345 = vmatpush3.bf16.msra.mxu1 %v344_v8  ;;  %v350_v21 = vpack.c.bf16 %v208_v20, %v207_v19  ;;  %v299_v23 = vld [vmem:[%s445_s4] ss:$0 sm:$0xff] }
   0x7   :  { %319 = vmatmul.mubr.msk.f32.vlgmr.msra.gmra.mrb[0].mxu0 %vm38_vm4, %v28_v5  ;;  %346 = vmatprep.subr.bf16.mxu1 %v356_v0 }
   0x8   :  { %336 = vmatprep.mubr.msk.f32.mxu0 %vm358_vm3, %v359_v4  ;;  %351 = vmatpush3.bf16.msra.mxu0 %v350_v21 }
   0x9   :  { %v301_v30 = vld [vmem:[#allocation2] ss:$0 sm:$0xff] }
   0xa   :  { %348 = vmatpush3.bf16.msra.mxu1 %v347_v11 }
  0xda   :  { %v112_v13 = vpop.f32.mrb[0].mxu0 }
  0xdb   :  { %v113_v14 = vadd.f32 %v296_v12, %v112_v13  ;;  %v320_v15 = vpop.f32.mrb[1].mxu0 }
  0xdd   :  { %v116_v16 = vmul.f32 0.01, %v113_v14 }
  0xdf   :  { %v117_v17 = vadd.f32 1.0, %v116_v16 }
  0xe1   :  { %v118_v18 = vmul.f32 %v117_v17, %v113_v14 }
  0xe3   :  { %330 = vmatmul.mubr.msk.f32.vlgmr.msra.gmra.mrb[0].mxu1 %vm130_vm5, %v118_v18 }
 0x1b6   :  { %v200_v24 = vpop.f32.mrb[0].mxu1 }
 0x1b7   :  { %v201_v25 = vadd.f32 %v299_v23, %v200_v24  ;;  %v331_v26 = vpop.f32.mrb[1].mxu1 }
 0x1b9   :  { %v204_v27 = vmul.f32 0.01, %v201_v25 }
 0x1bb   :  { %v205_v28 = vadd.f32 1.0, %v204_v27 }
 0x1bd   :  { %v206_v29 = vmul.f32 %v205_v28, %v201_v25 }
 0x1bf   :  { %337 = vmatmul.mubr.msk.f32.vlgmr.msra.gmra.mrb[2].mxu0 %vm216_vm6, %v206_v29 }
 0x292   :  { %v286_v31 = vpop.f32.mrb[2].mxu0 }
 0x293   :  { %v287_v32 = vadd.f32 %v301_v30, %v286_v31  ;;  %v338_v33 = vpop.f32.mrb[3].mxu0 }
 0x295   :  { %291 = vst.msk [vmem:[%s446_s7] sm:$0xff] %vm290_vm7, %v287_v32 }

</bundles_post_ra>
